<compile_context>
chip_gen: v7x
topology: tpu7x:2x2x1
jax: 0.10.0
libtpu: 0.0.40
codegen_flags: <defaults>
</compile_context>

<pallas_src>
import jax
import jax.numpy as jnp
from jax.experimental import pallas as pl
from jax.experimental.pallas import tpu as pltpu


def _round_up(x: int, m: int) -> int:
    return (x + m - 1) // m * m


def _patch_embed_kernel(patch_ref, w_ref, add_ref, cls_ref, o_ref):
    # patch_ref: (Bt, N, K)     bf16 -- streamed batch tile of flattened patches
    # w_ref    : (K, Ep)        bf16 -- projection weight, VMEM-resident (grid-invariant)
    # add_ref  : (N, Ep)        f32  -- conv bias + positions[1:], VMEM-resident
    # cls_ref  : (1, Ep)        f32  -- cls_token + positions[0], VMEM-resident
    # o_ref    : (Bt, N+1, Ep)  f32
    bt, n, k = patch_ref.shape
    ep = w_ref.shape[1]

    # Fold batch into the matmul M dimension -> one MXU call per grid step.
    p = patch_ref[...].reshape(bt * n, k)
    proj = jnp.dot(p, w_ref[...], preferred_element_type=jnp.float32)   # (Bt*N, Ep) f32
    proj = proj.reshape(bt, n, ep) + add_ref[...][None, :, :]           # f32 add

    # Patch rows -> token slots 1..N; batch-invariant cls row -> slot 0.
    o_ref[:, 1:, :] = proj.astype(o_ref.dtype)
    o_ref[:, 0:1, :] = jnp.broadcast_to(
        cls_ref[...][None, :, :], (bt, 1, ep)).astype(o_ref.dtype)


def _choose_batch_tile(B: int, requested: int) -> int:
    bt = max(1, min(requested, B))
    while B % bt != 0:            # avoid padded dummy batches
        bt -= 1
    if B // bt < 2 and bt > 1:    # keep >= 2 grid steps so v7x's 2 TCs both work
        bt = max(1, bt // 2)
        while B % bt != 0:
            bt -= 1
    return bt


def patch_embedding(x, conv_w, conv_b, cls_token, positions, patch_size,
                    *, batch_tile: int = 4):
    """x: (B, C, H, W) float32.  Returns (B, (H//P)*(W//P) + 1, E)."""
    B, C, H, W = x.shape
    P = patch_size
    E = conv_w.shape[0]
    nh, nw = H // P, W // P
    N = nh * nw
    K = C * P * P

    # Lane-dense embedding dim (no-op for real ViT E >= 128).
    Ep = _round_up(E, 128)

    # --- im2col: NCHW -> (B, N, K), K flattened in (c, kh, kw) order to match
    #     the Conv2d weight layout; marked fusible into the Pallas input DMA.
    patches = x.reshape(B, C, nh, P, nw, P)
    patches = patches.transpose(0, 2, 4, 1, 3, 5).reshape(B, N, K)
    patches = patches.astype(jnp.bfloat16)                       # bf16 MXU path

    # --- projection weight (E, C, P, P) -> (K, Ep), bf16, VMEM-resident.
    w = conv_w.reshape(E, K).T.astype(jnp.bfloat16)
    if Ep != E:
        w = jnp.pad(w, ((0, 0), (0, Ep - E)))

    # --- small batch-invariant additive operands (VMEM-resident, no HBM stream):
    addend = (positions[1:] + conv_b[None, :]).astype(jnp.float32)            # (N, E)
    cls_row = (cls_token.reshape(1, E) + positions[0:1]).astype(jnp.float32)  # (1, E)
    if Ep != E:
        addend = jnp.pad(addend, ((0, 0), (0, Ep - E)))
        cls_row = jnp.pad(cls_row, ((0, 0), (0, Ep - E)))

    bt = _choose_batch_tile(B, batch_tile)
    grid = (B // bt,)

    # VMEM budget: double-buffered streamed tiles + resident operands.
    vmem_bytes = (2 * bt * N * K * 2            # patch tiles (bf16)
                  + 2 * bt * (N + 1) * Ep * 4   # output tiles (f32)
                  + K * Ep * 2                  # resident weight
                  + (N + 1) * Ep * 4)           # resident addend + cls row
    vmem_limit = max(16 << 20, min(int(1.5 * vmem_bytes) + (4 << 20), 48 << 20))

    cost = pl.CostEstimate(
        flops=2 * B * N * K * Ep,
        bytes_accessed=(B * N * K * 2 + K * Ep * 2 + (N + 1) * Ep * 4
                        + B * (N + 1) * Ep * 4),
        transcendentals=0,
    )

    out = pl.pallas_call(
        _patch_embed_kernel,
        out_shape=jax.ShapeDtypeStruct((B, N + 1, Ep), jnp.float32),
        grid_spec=pltpu.PrefetchScalarGridSpec(
            num_scalar_prefetch=0,
            grid=grid,
            in_specs=[
                # Streamed batch tile (N, K are full dims -> (8,128) rule OK).
                pl.BlockSpec((bt, N, K), lambda i: (i, 0, 0)),
                # Grid-invariant operands: whole array resident in VMEM once.
                pl.BlockSpec(memory_space=pltpu.MemorySpace.VMEM),   # W
                pl.BlockSpec(memory_space=pltpu.MemorySpace.VMEM),   # addend
                pl.BlockSpec(memory_space=pltpu.MemorySpace.VMEM),   # cls row
            ],
            out_specs=pl.BlockSpec((bt, N + 1, Ep), lambda i: (i, 0, 0)),
        ),
        compiler_params=pltpu.CompilerParams(
            dimension_semantics=("parallel",),            # batch tiles across TCs
            vmem_limit_bytes=vmem_limit,
            allow_input_fusion=[True, False, False, False],  # fuse im2col into input DMA
        ),
        cost_estimate=cost,
    )(patches, w, addend, cls_row)

    if Ep != E:
        out = out[:, :, :E]
    return out.astype(x.dtype)


if __name__ == "__main__":
    # Small, module-consistent shapes.
    B, C, IMG, P, E = 2, 4, 16, 4, 32
    nh = IMG // P
    N = nh * nh                      # 16 patches
    K = C * P * P                    # 64

    key = jax.random.PRNGKey(0)
    kx, kw, kb, kc, kp = jax.random.split(key, 5)

    x = jax.random.normal(kx, (B, C, IMG, IMG), dtype=jnp.float32)
    conv_w = jax.random.normal(kw, (E, C, P, P), dtype=jnp.float32) * 0.02
    conv_b = jax.random.normal(kb, (E,), dtype=jnp.float32) * 0.02
    cls_token = jax.random.normal(kc, (1, 1, E), dtype=jnp.float32)
    positions = jax.random.normal(kp, (N + 1, E), dtype=jnp.float32)

    out = patch_embedding(x, conv_w, conv_b, cls_token, positions, P)
    out = jax.block_until_ready(out)
    assert out.shape == (B, N + 1, E)

    # --- references ------------------------------------------------------
    patches_ref = x.reshape(B, C, nh, P, nh, P)
    patches_ref = patches_ref.transpose(0, 2, 4, 1, 3, 5).reshape(B, N, K)
    w_t = conv_w.reshape(E, K).T

    # f32 reference (exact PyTorch semantics).
    proj_f32 = patches_ref @ w_t + conv_b
    ref_f32 = jnp.concatenate(
        [jnp.broadcast_to(cls_token.reshape(1, 1, E), (B, 1, E)), proj_f32], axis=1
    ) + positions

    # bf16-operand / f32-accumulation reference (matches kernel arithmetic).
    proj_bf16 = jnp.dot(
        patches_ref.reshape(B * N, K).astype(jnp.bfloat16),
        w_t.astype(jnp.bfloat16),
        preferred_element_type=jnp.float32,
    ).reshape(B, N, E) + conv_b
    ref_bf16 = jnp.concatenate(
        [jnp.broadcast_to(cls_token.reshape(1, 1, E), (B, 1, E)), proj_bf16], axis=1
    ) + positions

    assert jnp.allclose(out, ref_bf16, atol=1e-4, rtol=1e-4)   # kernel mechanics
    assert jnp.allclose(out, ref_f32, atol=1e-2, rtol=1e-2)    # module semantics (bf16 tol)

    print("KERNEL_OK")
</pallas_src>

<mosaic_0001>
module attributes {stable_mosaic.version = 11 : i64} {
  func.func @_patch_embed_kernel(%arg0: i32, %arg1: memref<1x16x64xbf16, #tpu.memory_space<vmem>>, %arg2: memref<64x128xbf16, #tpu.memory_space<vmem>>, %arg3: memref<16x128xf32, #tpu.memory_space<vmem>>, %arg4: memref<1x128xf32, #tpu.memory_space<vmem>>, %arg5: memref<1x17x128xf32, #tpu.memory_space<vmem>>) attributes {dimension_semantics = [#tpu.dimension_semantics<parallel>], iteration_bounds = array<i64: 2>, scalar_prefetch = 0 : i64, scratch_operands = 0 : i64, tpu.core_type = #tpu.core_type<tc>, window_params = [{transform_indices = @transform_0, window_bounds = array<i64: 1, 16, 64>}, {pipeline_mode = #tpu.pipeline_mode<synchronous>, transform_indices = @transform_1, window_bounds = array<i64: 64, 128>}, {pipeline_mode = #tpu.pipeline_mode<synchronous>, transform_indices = @transform_2, window_bounds = array<i64: 16, 128>}, {pipeline_mode = #tpu.pipeline_mode<synchronous>, transform_indices = @transform_3, window_bounds = array<i64: 1, 128>}, {transform_indices = @transform_4, window_bounds = array<i64: 1, 17, 128>}]} {
    %c0 = arith.constant 0 : index
    %c0_0 = arith.constant 0 : index
    %c0_1 = arith.constant 0 : index
    %0 = vector.load %arg1[%c0, %c0_0, %c0_1] : memref<1x16x64xbf16, #tpu.memory_space<vmem>>, vector<1x16x64xbf16>
    %1 = vector.shape_cast %0 : vector<1x16x64xbf16> to vector<16x64xbf16>
    %c0_2 = arith.constant 0 : index
    %c0_3 = arith.constant 0 : index
    %2 = vector.load %arg2[%c0_2, %c0_3] : memref<64x128xbf16, #tpu.memory_space<vmem>>, vector<64x128xbf16>
    %cst = arith.constant dense<0.000000e+00> : vector<16x128xf32>
    %3 = tpu.matmul %1, %2, %cst {dimension_numbers = #tpu.dot_dimension_numbers<[1], [0], [0], [1], [0, 0, 1, 1], [], []>} : vector<16x64xbf16>, vector<64x128xbf16>, vector<16x128xf32> -> vector<16x128xf32>
    %4 = vector.shape_cast %3 : vector<16x128xf32> to vector<1x16x128xf32>
    %c0_4 = arith.constant 0 : index
    %c0_5 = arith.constant 0 : index
    %5 = vector.load %arg3[%c0_4, %c0_5] : memref<16x128xf32, #tpu.memory_space<vmem>>, vector<16x128xf32>
    %6 = vector.shape_cast %5 : vector<16x128xf32> to vector<1x16x128xf32>
    %7 = arith.addf %4, %6 : vector<1x16x128xf32>
    %c0_6 = arith.constant 0 : index
    %c1 = arith.constant 1 : index
    %c0_7 = arith.constant 0 : index
    %8 = vector.load %arg5[%c0_6, %c1, %c0_7] : memref<1x17x128xf32, #tpu.memory_space<vmem>>, vector<1x16x128xf32>
    tpu.vector_store %arg5[%c0_6, %c1, %c0_7], %7 {strides = array<i32>} : memref<1x17x128xf32, #tpu.memory_space<vmem>>, vector<1x16x128xf32>,
    %c0_8 = arith.constant 0 : index
    %c0_9 = arith.constant 0 : index
    %9 = vector.load %arg4[%c0_8, %c0_9] : memref<1x128xf32, #tpu.memory_space<vmem>>, vector<1x128xf32>
    %10 = vector.shape_cast %9 : vector<1x128xf32> to vector<1x1x128xf32>
    %c0_10 = arith.constant 0 : index
    %c0_11 = arith.constant 0 : index
    %c0_12 = arith.constant 0 : index
    %11 = vector.load %arg5[%c0_10, %c0_11, %c0_12] : memref<1x17x128xf32, #tpu.memory_space<vmem>>, vector<1x1x128xf32>
    tpu.vector_store %arg5[%c0_10, %c0_11, %c0_12], %10 {strides = array<i32>} : memref<1x17x128xf32, #tpu.memory_space<vmem>>, vector<1x1x128xf32>,
    return
  }
  func.func @transform_0(%arg0: i32) -> (i32, i32, i32) {
    %c0_i32 = arith.constant 0 : i32
    %c0_i32_0 = arith.constant 0 : i32
    %c0_i32_1 = arith.constant 0 : i32
    return %arg0, %c0_i32, %c0_i32_0 : i32, i32, i32
  }
  func.func @transform_1(%arg0: i32) -> (i32, i32) {
    %c0_i32 = arith.constant 0 : i32
    %c0_i32_0 = arith.constant 0 : i32
    %c0_i32_1 = arith.constant 0 : i32
    return %c0_i32, %c0_i32_0 : i32, i32
  }
  func.func @transform_2(%arg0: i32) -> (i32, i32) {
    %c0_i32 = arith.constant 0 : i32
    %c0_i32_0 = arith.constant 0 : i32
    %c0_i32_1 = arith.constant 0 : i32
    return %c0_i32, %c0_i32_0 : i32, i32
  }
  func.func @transform_3(%arg0: i32) -> (i32, i32) {
    %c0_i32 = arith.constant 0 : i32
    %c0_i32_0 = arith.constant 0 : i32
    %c0_i32_1 = arith.constant 0 : i32
    return %c0_i32, %c0_i32_0 : i32, i32
  }
  func.func @transform_4(%arg0: i32) -> (i32, i32, i32) {
    %c0_i32 = arith.constant 0 : i32
    %c0_i32_0 = arith.constant 0 : i32
    %c0_i32_1 = arith.constant 0 : i32
    return %arg0, %c0_i32, %c0_i32_0 : i32, i32, i32
  }
}

</mosaic_0001>

<bundles_post_ra>
// kernel: tpu_custom_call.1
= control target key start
LH: loop header
LB: loop body
LE: loop exit
PB: predicated region body
PF: predicated region fallthrough
CT: control target
= control target key end

     0   :  { %9 = vsyncpa [#allocation3], 0  ;;  %s881_s0 = inlined_call_operand.hbm [shape: bf16[2,16,64], index: 0, kind: input, shape index: {}]   ;;  %s882_s1 = inlined_call_operand.hbm [shape: bf16[64,128], index: 1, kind: input, shape index: {}]   ;;  %s883_s2 = inlined_call_operand.hbm [shape: f32[16,128], index: 2, kind: input, shape index: {}]   ;;  %s884_s3 = inlined_call_operand.vmem [shape: f32[1,128], index: 3, kind: input, shape index: {}]   ;;  %s885_s4 = inlined_call_operand.vmem [shape: f32[2,17,128], index: 4, kind: output, shape index: {}]  }
   0x1   :  { %11 = vsyncpa [#allocation3 + $0x1], 0 }
   0x2   :  { %12 = vsyncpa [#allocation5], 0  ;;  %s697_s15 = smov 0   ;;  %s699_s16 = smov 0  }
   0x3   :  { %s701_s17 = smov 0   ;;  %s703_s18 = smov 0  }
   0x4 LB: > { %s716_s19 = sadd.s32 4294967295, %s661_s18   ;;  %p38_p0 = scmp.ne.s32.totalorder %s653_s16, %s649_s15  ;;  %s661_s18 = sphi %s703_s18, %s900_s18   ;;  %s657_s17 = sphi %s701_s17, %s899_s17   ;;  %s653_s16 = sphi %s699_s16, %s898_s16   ;;  %s649_s15 = sphi %s697_s15, %s897_s15  }
   0x5   : > { %p886_p1 = scmp.eq.s32.totalorder %s716_s19, 0  ;;  %p427_p2 = scmp.ge.s32.totalorder %s661_s18, 1 }
   0x6   : > { %p138_p3 = scmp.lt.s32.totalorder %s661_s18, 3  ;;  %s663_s22 = smov [#allocation4]  }
   0x7   : > { %p724_p4 = por %p886_p1, %p38_p0  ;;  %s150_s23 = sshll.u32 %s663_s22, 4  ;;  %s151_s23 = int_to_ptr.vmem [resolvable:$true] %s150_s23 }
   0x8   : > { %p728_p5 = pnand %p427_p2, %p138_p3  ;;  %s664_s25 = smov [#allocation6]  }
   0x9   : > { %s889_s20 = scalar_select %p724_p4, 1, 0 }
   0xa   : > { %s890_s21 = scalar_select %p728_p5, 1, 0 }
   0xb   : > { %p476_p6 = pneg %p728_p5  ;;  %s163_s26 = sshll.u32 %s664_s25, 4  ;;  %s740_s26 = int_to_ptr.vmem [resolvable:$true] %s163_s26 }
   0xc   : > { %s537_s29 = scalar_lea.hbm %s882_s1, 512 }
   0xd   : > { %p736_p7 = pnand %p476_p6, %p886_p1  ;;  %p538_p8 = scmp.ne.s32.totalorder %s882_s1, %s537_s29 }
   0xe   : > { %p544_p12 = scmp.lt.u32.totalorder %s537_s29, %s882_s1 }
   0xf   : > { %p539_p9 = pneg %p736_p7 }
  0x11   : > { %p540_p10 = pnand %p539_p9, %p538_p8 }
  0x13   : > { %p541_p11 = pneg %p540_p10 }
  0x15   : > { %p546_p13 = pnand %p544_p12, %p541_p11 }
  0x17   : > { %549 = shalt.err (!%p546_p13)
}
  0x18   : > { %s550_s8 = scalar_lea.vmem %s151_s23, 512  ;;  %p558_p6 = scmp.lt.s32.totalorder %s151_s23, %s151_s23 }
  0x19   : > { %p551_p0 = scmp.ne.s32.totalorder %s151_s23, %s550_s8  ;;  %p559_p1 = scmp.lt.s32.totalorder %s550_s8, %s550_s8 }
  0x1b   : > { %p553_p2 = pnand %p551_p0, %p539_p9  ;;  %p560_p4 = por %p559_p1, %p558_p6 }
  0x1d   : > { %p554_p3 = pneg %p553_p2 }
  0x1f   : > { %p561_p5 = pnand %p560_p4, %p554_p3 }
  0x21   : > { %564 = shalt.err (!%p561_p5)
}
  0x22   : > { %s665_s9 = smov 64   ;;  %s666_s10 = smov 4  }
  0x23   : > { %479 = dma.hbm_to_vmem [thread:$0]  (!%p736_p7), %s882_s1, 512, %s151_s23, [#allocation5], %s665_s9, %s665_s9, %s666_s10  }
  0x24   : > { %s565_s15 = scalar_lea.hbm %s883_s2, 256 }
  0x25   : > { %p566_p1 = scmp.ne.s32.totalorder %s883_s2, %s565_s15  ;;  %p572_p8 = scmp.lt.u32.totalorder %s565_s15, %s883_s2 }
  0x27   : > { %p568_p4 = pnand %p566_p1, %p539_p9 }
  0x29   : > { %p569_p5 = pneg %p568_p4 }
  0x2b   : > { %p574_p10 = pnand %p572_p8, %p569_p5 }
  0x2d   : > { %577 = shalt.err (!%p574_p10)
}
  0x2e   : > { %s578_s23 = scalar_lea.vmem %s740_s26, 256  ;;  %p586_p0 = scmp.lt.s32.totalorder %s740_s26, %s740_s26 }
  0x2f   : > { %p579_p11 = scmp.ne.s32.totalorder %s740_s26, %s578_s23  ;;  %p587_p2 = scmp.lt.s32.totalorder %s578_s23, %s578_s23 }
  0x31   : > { %p581_p12 = pnand %p579_p11, %p539_p9  ;;  %p588_p3 = por %p587_p2, %p586_p0 }
  0x33   : > { %p582_p13 = pneg %p581_p12 }
  0x35   : > { %p589_p6 = pnand %p588_p3, %p582_p13 }
  0x37   : > { %592 = shalt.err (!%p589_p6)
}
  0x38   : > { %s667_s29 = smov 128   ;;  %s668_s30 = smov 8  }
  0x39   : > { %482 = dma.hbm_to_vmem [thread:$0]  (!%p736_p7), %s883_s2, 256, %s740_s26, [#allocation5], %s667_s29, %s667_s29, %s668_s30  }
  0x3a   : > { %s793_s7 = sadd.s32 1, %s661_s18   ;;  %s25_s11 = sadd.s32 1, %s657_s17 }
  0x3b   : > { %s22_s8 = ssub.s32 %s661_s18, %s793_s7  ;;  %p32_p1 = scmp.ne.s32.totalorder %s657_s17, %s653_s16 }
  0x3c   : > { %p23_p9 = scmp.eq.s32.totalorder %s22_s8, 0  ;;  %p33_p4 = scmp.eq.s32.totalorder %s661_s18, 0 }
  0x3d   : > { %p489_p8 = scmp.lt.s32.totalorder %s661_s18, 2  ;;  %s180_s13 = sand.u32 1, %s657_s17  }
  0x3e   : > { %s802_s12 = scalar_select %p23_p9, %s657_s17, %s25_s11  }
  0x3f   : > { %p34_p5 = por %p33_p4, %p32_p1  ;;  %s447_s14 = sshll.u32 %s661_s18, 7 }
  0x40   : > { %s431_s15 = sshll.u32 %s180_s13, 3  ;;  %s810_s25 = scalar_lea.hbm %s881_s0, %s447_s14 }
  0x41   : > { %s184_s26 = scalar_lea.vmem [#allocation2], %s431_s15  ;;  %p812_p7 = pnand %p489_p8, %p34_p5 }
  0x42   : > { %s191_s27 = sshll.u32 %s184_s26, 4  ;;  %s818_s18 = scalar_lea.sflag [#allocation3], %s180_s13  ;;  %s816_s27 = int_to_ptr.vmem [resolvable:$true] %s191_s27 }
  0x43   : > { %s593_s23 = scalar_lea.hbm %s810_s25, 128  ;;  %p595_p11 = pneg %p812_p7 }
  0x44   : > { %p594_p10 = scmp.ne.s32.totalorder %s810_s25, %s593_s23  ;;  %s598_s5 = scalar_lea.hbm %s881_s0, 256 }
  0x45   : > { %p599_p0 = scmp.lt.u32.totalorder %s810_s25, %s881_s0  ;;  %p600_p2 = scmp.lt.u32.totalorder %s598_s5, %s593_s23 }
  0x46   : > { %p596_p12 = pnand %p595_p11, %p594_p10  ;;  %p602_p6 = scmp.lt.u32.totalorder %s593_s23, %s810_s25 }
  0x47   : > { %p601_p3 = por %p600_p2, %p599_p0 }
  0x48   : > { %p597_p13 = pneg %p596_p12 }
  0x49   : > { %p603_p9 = por %p602_p6, %p601_p3 }
  0x4b   : > { %p604_p1 = pnand %p603_p9, %p597_p13 }
  0x4d   : > { %607 = shalt.err (!%p604_p1)
}
  0x4e   : > { %s608_s11 = scalar_lea.vmem %s816_s27, 128  ;;  %s669_s13 = smov [#allocation2]  }
  0x4f   : > { %p609_p4 = scmp.ne.s32.totalorder %s816_s27, %s608_s11  ;;  %s613_s14 = sshll.u32 %s669_s13, 4  ;;  %s614_s14 = int_to_ptr.vmem [resolvable:$false] %s613_s14 }
  0x50   : > { %s615_s15 = scalar_lea.vmem %s614_s14, 256  ;;  %p616_p10 = scmp.lt.s32.totalorder %s816_s27, %s614_s14 }
  0x51   : > { %p611_p5 = pnand %p609_p4, %p595_p11  ;;  %p617_p12 = scmp.lt.s32.totalorder %s615_s15, %s608_s11 }
  0x53   : > { %p612_p8 = pneg %p611_p5  ;;  %p618_p0 = por %p617_p12, %p616_p10 }
  0x55   : > { %p619_p2 = pnand %p618_p0, %p612_p8 }
  0x57   : > { %622 = shalt.err (!%p619_p2)
}
  0x58   : > { %486 = dma.hbm_to_vmem [thread:$0]  (!%p812_p7), %s810_s25, 128, %s816_s27, %s818_s18, %s665_s9, %s665_s9, %s666_s10  }
  0x59   : > { %p893_p11 = scmp.ne.s32.totalorder %s890_s21, 0 }
  0x5a   : > { %s205_s24 = sand.u32 (!%p893_p11), 1, %s653_s16   ;;  %p894_p13 = scmp.ne.s32.totalorder (!%p893_p11), %s889_s20, 0 }
  0x5b   : > { %203 = sbr.rel (%p893_p11) target bundleno = 336 (0x150), region = 36  ;;  %s435_s22 = sshll.u32 (!%p893_p11), %s205_s24, 3 }
  0x5c   : > { %s206_s26 = scalar_lea.sflag (!%p893_p11), [#allocation3], %s205_s24  ;;  %s209_s23 = scalar_lea.vmem (!%p893_p11), [#allocation2], %s435_s22 }
  0x62   : > { %640 = dma.done.wait (%p894_p13), %s206_s26, 128  }
  0x63   : > { %642 = vsyncadd (%p894_p13), %s206_s26, 4294967168  ;;  %p895_p3 = scmp.eq.s32.totalorder %s716_s19, 0 }
  0x65   : > { %644 = dma.done.wait (%p895_p3), [#allocation5], 768   ;;  %p896_p6 = pmov %p895_p3 }
  0x66   : > { %v670_v0 = vmov 0.0   ;;  %vm671_vm0 = vmmov 0   ;;  %v532_v1 = vld [vmem:[#allocation4] sm:$0xff]   ;;  %v533_v2 = vld [vmem:[#allocation4 + $0x8] sm:$0xff]   ;;  %v534_v3 = vld [vmem:[#allocation4 + $0x10] sm:$0xff]   ;;  %vm287_vm1 = vcmask 523264  }
  0x67   : > { %646 = vsyncadd (%p896_p6), [#allocation5], 4294966528  ;;  %453 = vmatprep.subr.bf16.mxu0 %v670_v0  ;;  %461 = vmatprep.mubr.msk.bf16.mxu0 %vm671_vm0, %v670_v0  ;;  %v535_v4 = vld [vmem:[#allocation4 + $0x18] sm:$0xff]   ;;  %p242_p7 = scmp.lt.s32.totalorder %s716_s19, 1  ;;  %v338_v6 = vld [vmem:[%s884_s3] sm:$0x1] }
  0x68   : > { %454 = vmatpush3.bf16.msra.mxu0 %v532_v1  ;;  %v536_v5 = vld [vmem:[%s209_s23] sm:$0xff]   ;;  %v332_v7 = vld [vmem:[#allocation6] sm:$0xff]  ;;  %v333_v9 = vld [vmem:[#allocation6 + $0x8] sm:$0xff] }
  0x69   : > { %455 = vmatprep.subr.bf16.mxu0 %v670_v0  ;;  %s902_s19 = smov (!%p242_p7, %s716_s19), 1 }
  0x6a   : > { %s465_s20 = smul.u32 24, %s902_s19 }
  0x6c   : > { %456 = vmatpush3.bf16.msra.mxu0 %v533_v2  ;;  %s246_s10 = scalar_lea.vmem %s885_s4, %s465_s20 }
  0x6d   : > { %457 = vmatprep.subr.bf16.mxu0 %v670_v0  ;;  %339 = vst [vmem:[%s246_s10] sm:$0x1] %v338_v6 }
  0x70   : > { %458 = vmatpush3.bf16.msra.mxu0 %v534_v3 }
  0x71   : > { %459 = vmatprep.subr.bf16.mxu0 %v670_v0 }
  0x74   : > { %460 = vmatpush3.bf16.msra.mxu0 %v535_v4 }
  0x77   : > { %462 = vmatmul.mubr.msk.bf16.vlgmr.msra.gmra.mrb[0].mxu0 %vm287_vm1, %v536_v5 }
 0x14a   : > { %v325_v8 = vpop.f32.mrb[0].mxu0 }
 0x14b   : > { %v334_v10 = vadd.f32 %v332_v7, %v325_v8  ;;  %v463_v11 = vpop.f32.mrb[1].mxu0 }
 0x14c   : > { %v328_v12 = vpop.f32.mrb[2].mxu0 }
 0x14d   : > { %336 = vst [vmem:[%s246_s10 + $0x1] sm:$0xff] %v334_v10  ;;  %v335_v13 = vadd.f32 %v333_v9, %v328_v12  ;;  %v464_v14 = vpop.f32.mrb[3].mxu0 }
 0x14f   : > { %337 = vst [vmem:[%s246_s10 + $0x9] sm:$0xff] %v335_v13 }
 0x150 PF: > { %p15_p9 = scmp.ge.s32.totalorder %s793_s7, 4   ;;  %s897_s15 = smov %s653_s16 }
 0x151   : > { %s898_s16 = smov %s657_s17  ;;  %s899_s17 = smov %s802_s12 }
 0x152   : > { %s900_s18 = smov %s793_s7  ;;  %17 = sbr.rel (!%p15_p9) target bundleno = 4 (0x4), region = 84 }
 0x159   :  { %361 = vsyncpa [#allocation3], 1 }
 0x15a   :  { %363 = vsyncpa [#allocation3 + $0x1], 1 }
 0x15b   :  { %364 = vsyncpa [#allocation5], 1 }

</bundles_post_ra>
